<compile_context>
chip_gen: v7x
topology: tpu7x:2x2x1
jax: 0.10.0
libtpu: 0.0.40
codegen_flags: <defaults>
</compile_context>

<pallas_src>
import functools

import jax
import jax.numpy as jnp
from jax import lax
from jax.experimental import pallas as pl
from jax.experimental.pallas import tpu as pltpu


# ----------------------------------------------------------------------------
# helpers
# ----------------------------------------------------------------------------
def _round_up(x, m):
    return ((x + m - 1) // m) * m


@functools.lru_cache(maxsize=None)
def _roll_sign():
    """One-time probe pinning down pltpu.roll's rotation direction per axis.

    Returns (sign_rows, sign_cols) such that pltpu.roll(x, sign*k, axis)
    behaves like jnp.roll(x, k, axis); guarantees the conv taps can never be
    silently mirrored by a flipped convention."""
    x = jnp.arange(8 * 128, dtype=jnp.float32).reshape(8, 128)

    def probe(x_ref, o0_ref, o1_ref):
        o0_ref[...] = pltpu.roll(x_ref[...], 1, axis=0)
        o1_ref[...] = pltpu.roll(x_ref[...], 1, axis=1)

    r0, r1 = pl.pallas_call(
        probe,
        out_shape=(jax.ShapeDtypeStruct((8, 128), jnp.float32),
                   jax.ShapeDtypeStruct((8, 128), jnp.float32)),
    )(x)

    signs = []
    for rolled, axis in ((r0, 0), (r1, 1)):
        if bool(jnp.array_equal(rolled, jnp.roll(x, 1, axis=axis))):
            signs.append(1)
        elif bool(jnp.array_equal(rolled, jnp.roll(x, -1, axis=axis))):
            signs.append(-1)
        else:
            raise RuntimeError("pltpu.roll semantics probe failed")
    return tuple(signs)


def _shift_plus(t, d, axis, sign):
    """result[i] = t[(i + d) mod n] along `axis` (d, sign are Python ints)."""
    n = t.shape[axis]
    amt = (-d * sign) % n
    if amt == 0:
        return t
    return pltpu.roll(t, amt, axis=axis)


# ----------------------------------------------------------------------------
# packed-layout bookkeeping (static, host side)
# ----------------------------------------------------------------------------
def _pack_cfg(c, h, w):
    """Channel-packed tile layout for one conv stage.

    Tiles are (hp, tile_w); tile p holds channels p*n_seg .. p*n_seg+n_seg-1,
    each in its own seg_w-lane segment, valid in rows [0,h) and segment-columns
    [0,w), zero elsewhere."""
    hp = _round_up(h, 8)
    n_seg = 1
    for cand in (4, 2):
        if c % cand == 0 and (128 // cand) >= w:
            n_seg = cand
            break
    seg_w = (128 // n_seg) if n_seg > 1 else _round_up(w, 128)
    return dict(c=c, h=h, w=w, hp=hp, n_seg=n_seg, seg_w=seg_w,
                n_tiles=c // n_seg, tile_w=n_seg * seg_w)


# ----------------------------------------------------------------------------
# host-precomputed constants (replication matmuls + per-lane conv weights)
# ----------------------------------------------------------------------------
def _row_rep(rows_out_pad, rows_out_valid, rows_in):
    r = jnp.arange(rows_out_pad)[:, None]
    j = jnp.arange(rows_in)[None, :]
    return ((j == r // 2) & (r < rows_out_valid)).astype(jnp.float32)


def _col_rep_packed(cfg, w_in):
    """(n_seg, w_in, tile_w): 2x nearest column replication of one channel
    placed into its packed segment."""
    s = jnp.arange(cfg["n_seg"])[:, None, None]
    j = jnp.arange(w_in)[None, :, None]
    l = jnp.arange(cfg["tile_w"])[None, None, :]
    seg = l // cfg["seg_w"]
    k = l % cfg["seg_w"]
    return ((seg == s) & (k < cfg["w"]) & (j == k // 2)).astype(jnp.float32)


def _col_rep_planar(w_in_tile, w_out_valid, w_out_tile):
    j = jnp.arange(w_in_tile)[:, None]
    k = jnp.arange(w_out_tile)[None, :]
    return ((j == k // 2) & (k < w_out_valid)).astype(jnp.float32)


def _lane_weights(w_hwio, cfg):
    """Per-lane conv weights for the packed layout.

    Row ((ky*3+kx)*n_tiles + p)*c_out + co holds, at lane s*seg_w + j, the
    scalar W[ky,kx, p*n_seg+s, co]; the segment-boundary lanes of the kx=+/-1
    taps are zeroed so the lane-rolled tap can never pick up a neighbouring
    packed channel (this replaces the old '+1 column gutter' for free)."""
    n_seg, seg_w = cfg["n_seg"], cfg["seg_w"]
    n_tiles, tw = cfg["n_tiles"], cfg["tile_w"]
    c_out = w_hwio.shape[-1]
    wr = w_hwio.reshape(3, 3, n_tiles, n_seg, c_out)
    wr = jnp.transpose(wr, (0, 1, 2, 4, 3))                  # (ky,kx,p,co,s)
    lw = jnp.repeat(wr[..., None], seg_w, axis=-1)           # (...,s,seg_w)
    lw = lw.reshape(3, 3, n_tiles, c_out, tw)
    j = jnp.arange(tw) % seg_w
    lw = lw.at[:, 2].multiply((j != seg_w - 1).astype(lw.dtype))   # dx = +1
    lw = lw.at[:, 0].multiply((j != 0).astype(lw.dtype))           # dx = -1
    return lw.reshape(9 * n_tiles * c_out, tw)


# ----------------------------------------------------------------------------
# in-kernel building blocks
# ----------------------------------------------------------------------------
def _conv3x3_packed(src_ref, lw_ref, b_ref, cfg, c_out, lrelu, roll_sign):
    """3x3 stride-1 'same' conv + bias (+ optional LeakyReLU 0.2) on packed tiles.

    Streams packed input tiles from VMEM scratch `src_ref` ((n_tiles, hp, tw)).
    Returns c_out values of shape (hp, tw): each output channel replicated in
    every segment (valid at rows [0,h) / segment-cols [0,w))."""
    h, w, hp = cfg["h"], cfg["w"], cfg["hp"]
    n_seg, seg_w = cfg["n_seg"], cfg["seg_w"]
    n_tiles, tw = cfg["n_tiles"], cfg["tile_w"]
    sr, sc = roll_sign

    tile_vregs = (hp // 8) * max(tw // 128, 1)
    co_block = c_out if tile_vregs <= 4 else min(2, c_out)   # cap live accumulators
    wrap_rows = (h == hp)            # no spare zero row -> mask the wrapped row
    need_valid = (h < hp) or (w < seg_w)

    outs = []
    for co0 in range(0, c_out, co_block):
        cos = list(range(co0, min(co0 + co_block, c_out)))
        acc = {co: jnp.zeros((hp, tw), jnp.float32) for co in cos}
        for p in range(n_tiles):
            for ky in range(3):
                dy = ky - 1
                t = src_ref[p]                      # stream one tile from VMEM
                rowsh = _shift_plus(t, dy, 0, sr)
                if wrap_rows and dy != 0:
                    ridx = lax.broadcasted_iota(jnp.int32, (hp, tw), 0)
                    rowsh = jnp.where(ridx == (hp - 1 if dy == 1 else 0),
                                      0.0, rowsh)
                for kx in range(3):
                    tap = _shift_plus(rowsh, kx - 1, 1, sc)
                    base = ((ky * 3 + kx) * n_tiles + p) * c_out
                    for co in cos:
                        lw = lw_ref[pl.ds(base + co, 1), :]   # (1, tw) lane weights
                        acc[co] = acc[co] + tap * lw
        for co in cos:
            a = acc[co]
            step = tw // 2
            while step >= seg_w:                    # fold packed channels (XLU)
                a = a + _shift_plus(a, step, 1, sc)
                step //= 2
            a = a + b_ref[co]
            if lrelu:
                a = jnp.where(a >= 0, a, 0.2 * a)
            if need_valid:
                ridx = lax.broadcasted_iota(jnp.int32, (hp, tw), 0)
                cidx = lax.broadcasted_iota(jnp.int32, (hp, tw), 1)
                a = jnp.where((ridx < h) & ((cidx % seg_w) < w), a, 0.0)
            outs.append(a)
    return outs


def _repack_into(buf_ref, outs, cfg):
    """Write per-channel (segment-replicated) conv outputs back as packed tiles."""
    n_seg, seg_w = cfg["n_seg"], cfg["seg_w"]
    n_tiles, tw, hp = cfg["n_tiles"], cfg["tile_w"], cfg["hp"]
    if n_seg == 1:
        for q in range(n_tiles):
            buf_ref[q] = outs[q]
        return
    seg = lax.broadcasted_iota(jnp.int32, (hp, tw), 1) // seg_w
    for q in range(n_tiles):
        v = outs[q * n_seg]
        for s in range(1, n_seg):
            v = jnp.where(seg == s, outs[q * n_seg + s], v)
        buf_ref[q] = v


# ----------------------------------------------------------------------------
# fused Upsampler kernel
# ----------------------------------------------------------------------------
def _make_kernel(cfg1, cfg2, c_feat, c_out, roll_sign):
    h2, w2 = cfg2["h"], cfg2["w"]
    n_seg1, n_tiles1 = cfg1["n_seg"], cfg1["n_tiles"]
    n_seg2, n_tiles2, seg_w2 = cfg2["n_seg"], cfg2["n_tiles"], cfg2["seg_w"]
    hp1, tw1 = cfg1["hp"], cfg1["tile_w"]
    _, sc = roll_sign

    def kernel(x_ref, rows1_ref, cols1_ref, rows2_ref, cols2_ref,
               lw1_ref, lw2_ref, lw3_ref, lw4_ref,
               b1_ref, b2_ref, b3_ref, b4_ref,
               o_ref, buf1, buf2):
        # nearest 2x upsample of the input, written straight into the packed
        # stage-1 layout via 0/1 replication matmuls (MXU has slack).
        rows1 = rows1_ref[...]
        for p in range(n_tiles1):
            packed = jnp.zeros((hp1, tw1), jnp.float32)
            for s in range(n_seg1):
                ci = p * n_seg1 + s
                rowup = jnp.dot(rows1, x_ref[0, ci],
                                preferred_element_type=jnp.float32)
                packed = packed + jnp.dot(rowup, cols1_ref[s],
                                          preferred_element_type=jnp.float32)
            buf1[p] = packed

        # conv_up1 + LeakyReLU
        out1 = _conv3x3_packed(buf1, lw1_ref, b1_ref, cfg1, c_feat, True,
                               roll_sign)

        # nearest 2x upsample again, packed into the stage-2 layout
        for q in range(n_tiles2):
            rows2 = rows2_ref[...]
            cols2 = cols2_ref[...]
            v = None
            for s in range(n_seg2):
                u = jnp.dot(jnp.dot(rows2, out1[q * n_seg2 + s],
                                    preferred_element_type=jnp.float32),
                            cols2, preferred_element_type=jnp.float32)
                u = _shift_plus(u, -s * seg_w2, 1, sc)
                v = u if v is None else v + u
            buf2[q] = v

        # conv_up2 + LeakyReLU
        out2 = _conv3x3_packed(buf2, lw2_ref, b2_ref, cfg2, c_feat, True,
                               roll_sign)
        _repack_into(buf2, out2, cfg2)

        # conv_hr + LeakyReLU
        out3 = _conv3x3_packed(buf2, lw3_ref, b3_ref, cfg2, c_feat, True,
                               roll_sign)
        _repack_into(buf2, out3, cfg2)

        # conv_last (no activation); exact-shape output store
        out4 = _conv3x3_packed(buf2, lw4_ref, b4_ref, cfg2, c_out, False,
                               roll_sign)
        for co in range(c_out):
            o_ref[0, co] = out4[co][0:h2, 0:w2]

    return kernel


@functools.partial(jax.jit, static_argnames=("roll_sign",))
def _forward_impl(params, feat, *, roll_sign):
    n, c_feat, h0, w0 = feat.shape
    c_out = params["conv_last"][0].shape[-1]
    h1, w1, h2, w2 = 2 * h0, 2 * w0, 4 * h0, 4 * w0

    cfg1 = _pack_cfg(c_feat, h1, w1)
    cfg2 = _pack_cfg(c_feat, h2, w2)

    # host-side constants (hoisted out of the kernel / shared across layers)
    rows1 = _row_rep(cfg1["hp"], h1, h0)
    cols1 = _col_rep_packed(cfg1, w0)
    rows2 = _row_rep(cfg2["hp"], h2, cfg1["hp"])
    cols2 = _col_rep_planar(cfg1["tile_w"], w2, cfg2["tile_w"])
    lw1 = _lane_weights(params["conv_up1"][0], cfg1)
    lw2 = _lane_weights(params["conv_up2"][0], cfg2)
    lw3 = _lane_weights(params["conv_hr"][0], cfg2)
    lw4 = _lane_weights(params["conv_last"][0], cfg2)
    b1, b2, b3, b4 = (params[k][1] for k in
                      ("conv_up1", "conv_up2", "conv_hr", "conv_last"))

    kernel = _make_kernel(cfg1, cfg2, c_feat, c_out, roll_sign)

    def const_spec(a):
        nd = a.ndim
        return pl.BlockSpec(a.shape, lambda b, _nd=nd: (0,) * _nd)

    smem = pl.BlockSpec(memory_space=pltpu.MemorySpace.SMEM)

    in_specs = [pl.BlockSpec((1, c_feat, h0, w0), lambda b: (b, 0, 0, 0)),
                const_spec(rows1), const_spec(cols1),
                const_spec(rows2), const_spec(cols2),
                const_spec(lw1), const_spec(lw2),
                const_spec(lw3), const_spec(lw4),
                smem, smem, smem, smem]

    return pl.pallas_call(
        kernel,
        grid=(n,),
        in_specs=in_specs,
        out_specs=pl.BlockSpec((1, c_out, h2, w2), lambda b: (b, 0, 0, 0)),
        out_shape=jax.ShapeDtypeStruct((n, c_out, h2, w2), jnp.float32),
        scratch_shapes=[
            pltpu.VMEM((cfg1["n_tiles"], cfg1["hp"], cfg1["tile_w"]),
                       jnp.float32),
            pltpu.VMEM((cfg2["n_tiles"], cfg2["hp"], cfg2["tile_w"]),
                       jnp.float32),
        ],
        compiler_params=pltpu.CompilerParams(
            dimension_semantics=("parallel",)),
    )(feat, rows1, cols1, rows2, cols2, lw1, lw2, lw3, lw4, b1, b2, b3, b4)


def upsampler_forward(params, feat_nchw):
    """Full Upsampler forward; accepts/returns NCHW like the PyTorch module."""
    return _forward_impl(params, feat_nchw, roll_sign=_roll_sign())


# ----------------------------------------------------------------------------
# parameters / reference / demo
# ----------------------------------------------------------------------------
def init_upsampler_params(key, num_feat, num_out_ch):
    """Deterministic synthetic parameters (PyTorch Conv2d shapes, stored HWIO)."""
    def conv_params(k, cin, cout):
        kw, kb = jax.random.split(k)
        fan_in = cin * 3 * 3
        bound = 1.0 / (fan_in ** 0.5)
        w = jax.random.uniform(kw, (3, 3, cin, cout), jnp.float32, -bound, bound)
        b = jax.random.uniform(kb, (cout,), jnp.float32, -bound, bound)
        return w, b

    k1, k2, k3, k4 = jax.random.split(key, 4)
    return {
        "conv_up1": conv_params(k1, num_feat, num_feat),
        "conv_up2": conv_params(k2, num_feat, num_feat),
        "conv_hr": conv_params(k3, num_feat, num_feat),
        "conv_last": conv_params(k4, num_feat, num_out_ch),
    }


def _reference_forward(params, feat_nchw):
    """Pure-JAX reference (lax.conv) for correctness checking."""
    def conv(x, w, b):
        y = lax.conv_general_dilated(
            x, w, window_strides=(1, 1), padding="SAME",
            dimension_numbers=("NCHW", "HWIO", "NCHW"),
            precision=lax.Precision.HIGHEST)
        return y + b.reshape(1, -1, 1, 1)

    def up2(x):
        return jnp.repeat(jnp.repeat(x, 2, axis=2), 2, axis=3)

    def lrelu(x):
        return jnp.where(x >= 0, x, 0.2 * x)

    w, b = params["conv_up1"]
    x = lrelu(conv(up2(feat_nchw), w, b))
    w, b = params["conv_up2"]
    x = lrelu(conv(up2(x), w, b))
    w, b = params["conv_hr"]
    x = lrelu(conv(x, w, b))
    w, b = params["conv_last"]
    x = conv(x, w, b)
    return x


if __name__ == "__main__":
    key = jax.random.PRNGKey(0)
    k_param, k_input = jax.random.split(key)

    num_feat, num_out_ch = 4, 3
    N, H, W = 2, 16, 16

    params = init_upsampler_params(k_param, num_feat, num_out_ch)
    feat = jax.random.normal(k_input, (N, num_feat, H, W), jnp.float32)

    out = jax.block_until_ready(upsampler_forward(params, feat))
    assert out.shape == (N, num_out_ch, 4 * H, 4 * W), out.shape

    ref = jax.block_until_ready(_reference_forward(params, feat))
    max_err = float(jnp.max(jnp.abs(out - ref)))
    assert max_err < 1e-3, max_err

    print("KERNEL_OK")
</pallas_src>

<mosaic_0001>
module attributes {stable_mosaic.version = 11 : i64} {
  func.func @probe(%arg0: memref<8x128xf32, #tpu.memory_space<vmem>>, %arg1: memref<8x128xf32, #tpu.memory_space<vmem>>, %arg2: memref<8x128xf32, #tpu.memory_space<vmem>>) attributes {dimension_semantics = [], scalar_prefetch = 0 : i64, scratch_operands = 0 : i64, tpu.core_type = #tpu.core_type<tc>} {
    %c0 = arith.constant 0 : index
    %c0_0 = arith.constant 0 : index
    %0 = vector.load %arg0[%c0, %c0_0] : memref<8x128xf32, #tpu.memory_space<vmem>>, vector<8x128xf32>
    %c1_i32 = arith.constant 1 : i32
    %1 = tpu.dynamic_rotate %0 by %c1_i32 dim 0 : vector<8x128xf32>, i32 -> vector<8x128xf32>
    %c0_1 = arith.constant 0 : index
    %c0_2 = arith.constant 0 : index
    %2 = vector.load %arg1[%c0_1, %c0_2] : memref<8x128xf32, #tpu.memory_space<vmem>>, vector<8x128xf32>
    tpu.vector_store %arg1[%c0_1, %c0_2], %1 {strides = array<i32>} : memref<8x128xf32, #tpu.memory_space<vmem>>, vector<8x128xf32>,
    %c0_3 = arith.constant 0 : index
    %c0_4 = arith.constant 0 : index
    %3 = vector.load %arg0[%c0_3, %c0_4] : memref<8x128xf32, #tpu.memory_space<vmem>>, vector<8x128xf32>
    %c1_i32_5 = arith.constant 1 : i32
    %4 = tpu.dynamic_rotate %3 by %c1_i32_5 dim 1 : vector<8x128xf32>, i32 -> vector<8x128xf32>
    %c0_6 = arith.constant 0 : index
    %c0_7 = arith.constant 0 : index
    %5 = vector.load %arg2[%c0_6, %c0_7] : memref<8x128xf32, #tpu.memory_space<vmem>>, vector<8x128xf32>
    tpu.vector_store %arg2[%c0_6, %c0_7], %4 {strides = array<i32>} : memref<8x128xf32, #tpu.memory_space<vmem>>, vector<8x128xf32>,
    return
  }
}

</mosaic_0001>

<bundles_post_ra>
// kernel: tpu_custom_call.1
= control target key start
LH: loop header
LB: loop body
LE: loop exit
PB: predicated region body
PF: predicated region fallthrough
CT: control target
= control target key end

     0   :  { %8 = vsyncpa [#allocation3], 0  ;;  %s191_s0 = inlined_call_operand.hbm [shape: f32[8,128], index: 0, kind: input, shape index: {}]   ;;  %s192_s1 = inlined_call_operand.hbm [shape: f32[8,128], index: 1, kind: output, shape index: {0}]   ;;  %s193_s2 = inlined_call_operand.hbm [shape: f32[8,128], index: 2, kind: output, shape index: {1}]  }
   0x1   :  { %9 = vsyncpa [#allocation4], 0 }
   0x2   :  { %10 = vsyncpa [#allocation7], 0  ;;  %s136_s9 = smov [#allocation2]   ;;  %s64_s13 = scalar_lea.hbm %s191_s0, 128 }
   0x3   :  { %s17_s10 = sshll.u32 %s136_s9, 4  ;;  %p65_p0 = scmp.ne.s32.totalorder %s191_s0, %s64_s13  ;;  %s18_s10 = int_to_ptr.vmem [resolvable:$true] %s17_s10 }
   0x4   :  { %p68_p1 = scmp.lt.u32.totalorder %s64_s13, %s191_s0 }
   0x6   :  { %p70_p2 = pnand %p68_p1, %p65_p0 }
   0x8   :  { %73 = shalt.err (!%p70_p2)
}
   0x9   :  { %s74_s18 = scalar_lea.vmem %s18_s10, 128  ;;  %p79_p4 = scmp.lt.s32.totalorder %s18_s10, %s18_s10 }
   0xa   :  { %p75_p3 = scmp.ne.s32.totalorder %s18_s10, %s74_s18  ;;  %p80_p5 = scmp.lt.s32.totalorder %s74_s18, %s74_s18 }
   0xc   :  { %p81_p6 = por %p80_p5, %p79_p4 }
   0xe   :  { %p82_p7 = pnand %p81_p6, %p75_p3 }
  0x10   :  { %85 = shalt.err (!%p82_p7)
}
  0x11   :  { %20 = dma.hbm_to_vmem [thread:$0]  %s191_s0, 128, %s18_s10, [#allocation3]  }
  0x12   :  { %130 = dma.done.wait [#allocation3], 128  }
  0x13   :  { %131 = vsyncadd [#allocation3], 4294967168  ;;  %s137_s21 = smov [#allocation5]   ;;  %v27_v0 = vld [vmem:[#allocation2] sm:$0xff]  ;;  %s138_s23 = smov 1  }
  0x14   :  { %s37_s22 = sshll.u32 %s137_s21, 4  ;;  %28 = vrot.lane.b32.xlu0 %v27_v0, %s138_s23  ;;  %v25_v1 = vrot.slane %v27_v0, 7  ;;  %s38_s22 = int_to_ptr.vmem [resolvable:$true] %s37_s22 }
  0x15   :  { %s86_s24 = scalar_lea.vmem %s38_s22, 128  ;;  %p91_p9 = scmp.lt.s32.totalorder %s38_s22, %s38_s22 }
  0x16   :  { %26 = vst [vmem:[#allocation5] sm:$0xff] %v25_v1  ;;  %p87_p8 = scmp.ne.s32.totalorder %s38_s22, %s86_s24  ;;  %p92_p10 = scmp.lt.s32.totalorder %s86_s24, %s86_s24 }
  0x18   :  { %p93_p11 = por %p92_p10, %p91_p9 }
  0x1a   :  { %p94_p12 = pnand %p93_p11, %p87_p8 }
  0x1c   :  { %97 = shalt.err (!%p94_p12)
}
  0x1d   :  { %s98_s0 = scalar_lea.hbm %s192_s1, 128 }
  0x1e   :  { %p99_p13 = scmp.ne.s32.totalorder %s192_s1, %s98_s0  ;;  %p102_p0 = scmp.lt.u32.totalorder %s98_s0, %s192_s1 }
  0x20   :  { %p104_p1 = pnand %p102_p0, %p99_p13 }
  0x22   :  { %107 = shalt.err (!%p104_p1)
}
  0x23   :  { %40 = dma.vmem_to_hbm [thread:$0]  %s38_s22, 128, %s192_s1, [#allocation4]  }
  0x24   :  { %s139_s5 = smov [#allocation6]  }
  0x25   :  { %s47_s6 = sshll.u32 %s139_s5, 4  ;;  %s48_s6 = int_to_ptr.vmem [resolvable:$true] %s47_s6 }
  0x26   :  { %s108_s7 = scalar_lea.vmem %s48_s6, 128  ;;  %p113_p3 = scmp.lt.s32.totalorder %s48_s6, %s48_s6 }
  0x27   :  { %p109_p2 = scmp.ne.s32.totalorder %s48_s6, %s108_s7  ;;  %p114_p4 = scmp.lt.s32.totalorder %s108_s7, %s108_s7 }
  0x29   :  { %p115_p5 = por %p114_p4, %p113_p3 }
  0x2b   :  { %p116_p6 = pnand %p115_p5, %p109_p2 }
  0x86   :  { %v29_v2 = vpop.permute.xlu0 %28 }
  0x87   :  { %30 = vst [vmem:[#allocation6] sm:$0xff] %v29_v2 }
  0x88   :  { %119 = shalt.err (!%p116_p6)
}
  0x89   :  { %s120_s10 = scalar_lea.hbm %s193_s2, 128 }
  0x8a   :  { %p121_p7 = scmp.ne.s32.totalorder %s193_s2, %s120_s10  ;;  %p124_p8 = scmp.lt.u32.totalorder %s120_s10, %s193_s2 }
  0x8c   :  { %p126_p9 = pnand %p124_p8, %p121_p7 }
  0x8e   :  { %129 = shalt.err (!%p126_p9)
}
  0x8f   :  { %50 = dma.vmem_to_hbm [thread:$0]  %s48_s6, 128, %s193_s2, [#allocation7]  }
  0x90   :  { %132 = dma.done.wait [#allocation4], 128  }
  0x91   :  { %133 = vsyncadd [#allocation4], 4294967168 }
  0x92   :  { %134 = dma.done.wait [#allocation7], 128  }
  0x93   :  { %135 = vsyncadd [#allocation7], 4294967168 }
  0x94   :  { %57 = vsyncpa [#allocation3], 1 }
  0x95   :  { %58 = vsyncpa [#allocation4], 1 }
  0x96   :  { %59 = vsyncpa [#allocation7], 1 }

</bundles_post_ra>
